<compile_context>
chip_gen: v5e
topology: v5e:2x2
jax: 0.10.0
libtpu: 0.0.40
codegen_flags: <defaults>
</compile_context>

<pallas_src>
import functools

import jax
import jax.numpy as jnp
from jax.experimental import pallas as pl
from jax.experimental.pallas import tpu as pltpu


def _vmem_capacity_bytes():
    # Generation-aware VMEM size (v5e/v6e: 128 MiB per core, v7x: 64 MiB per TC).
    try:
        return int(pltpu.get_tpu_info().vmem_capacity_bytes)
    except Exception:
        return 64 << 20  # conservative fallback = smallest (v7x) per-TC VMEM


_VMEM_CAP = _vmem_capacity_bytes()
# Never request the entire physical VMEM: leave headroom for compiler-internal
# scratch and pipelining buffers.  64 MiB -> ~52 MiB, 128 MiB -> ~105 MiB.
_VMEM_BUDGET = int(max(24 << 20, min(int(_VMEM_CAP * 0.82), _VMEM_CAP - (12 << 20))))


# ----------------------------------------------------------------------------
# Path A: fused whole-slab kernel (pool + attention + combine), one grid step
# per batch element.  x_ref: (nb, channels, L); w1g_ref: (nb, nb, bot, channels)
# (PyTorch channel-regroup reshape, eval BatchNorm and the 1/L of the average
# pool are folded into w1g/w2/b2 in the wrapper); b1_ref: (bot, 1);
# w2_ref: (channels, bot); b2_ref: (channels, 1); o_ref: (channels, L).
# ----------------------------------------------------------------------------
def _gate_fused_kernel(x_ref, w1g_ref, b1_ref, w2_ref, b2_ref, o_ref):
    nb = x_ref.shape[0]

    # AdaptiveAvgPool1d(1): per-group length sums in f32 (1/L folded into w1g).
    # Leading-axis group indexing keeps loads tile-aligned for any `channels`.
    sums = [jnp.sum(x_ref[g].astype(jnp.float32), axis=1, keepdims=True)
            for g in range(nb)]                                  # nb x (channels, 1)

    # Tiny attention MLP (two 1x1 convs + ReLU + folded eval-mode BatchNorm).
    # These are once-per-batch-element micro-dots, fully hidden behind the slab DMA.
    logits = []
    for i in range(nb):
        h = b1_ref[...]
        for g in range(nb):
            h = h + jnp.dot(w1g_ref[i, g], sums[g],
                            preferred_element_type=jnp.float32)
        h = jnp.maximum(h, 0.0)                                  # ReLU
        z = jnp.dot(w2_ref[...], h,
                    preferred_element_type=jnp.float32) + b2_ref[...]
        logits.append(z)                                         # (channels, 1)

    # Softmax over the nb branches (runs once per batch element; exact divide —
    # an approx reciprocal would gain nothing here and costs tolerance margin).
    m = logits[0]
    for z in logits[1:]:
        m = jnp.maximum(m, z)
    exps = [jnp.exp(z - m) for z in logits]
    den = exps[0]
    for e in exps[1:]:
        den = den + e
    inv_den = 1.0 / den                                          # (channels, 1)

    # Weighted combine in the input dtype (no f32 copy of the slab): one FMA per
    # output element, lane-broadcast of the (channels, 1) weight columns.
    w0 = (exps[0] * inv_den).astype(o_ref.dtype)
    acc = w0 * x_ref[0]
    for i in range(1, nb):
        wi = (exps[i] * inv_den).astype(o_ref.dtype)
        acc = acc + wi * x_ref[i]
    o_ref[...] = acc.astype(o_ref.dtype)


# ----------------------------------------------------------------------------
# Path B: L-tiled combine with precomputed gate weights.
# w_ref: (nb, channels, 1) f32; x_ref: (nb, channels, TL); o_ref: (channels, TL).
# ----------------------------------------------------------------------------
def _gate_combine_kernel(w_ref, x_ref, o_ref):
    nb = x_ref.shape[0]
    acc = w_ref[0].astype(o_ref.dtype) * x_ref[0]
    for i in range(1, nb):
        acc = acc + w_ref[i].astype(o_ref.dtype) * x_ref[i]
    o_ref[...] = acc


@functools.partial(jax.jit,
                   static_argnames=("nb_input", "bn_eps", "force_tiled", "tile_l"))
def gate_module_forward(x, w1, b1, bn_gamma, bn_beta, bn_mean, bn_var, w2, b2,
                        *, nb_input=3, bn_eps=1e-5, force_tiled=False, tile_l=None):
    """x: (B, channels*nb_input, L); w1: (bottleneck, channels[,1]);
    w2: (channels, bottleneck[,1]); BN params/stats: (bottleneck,)."""
    B, C_total, L = x.shape
    channels = C_total // nb_input
    assert channels * nb_input == C_total, "channel dim must be channels*nb_input"

    w1m = jnp.asarray(w1, jnp.float32).reshape(-1, channels)        # (bot, ch)
    bottleneck = w1m.shape[0]
    w2m = jnp.asarray(w2, jnp.float32).reshape(channels, bottleneck)
    b1f = jnp.asarray(b1, jnp.float32)
    b2f = jnp.asarray(b2, jnp.float32)
    bn_gamma = jnp.asarray(bn_gamma, jnp.float32)
    bn_beta = jnp.asarray(bn_beta, jnp.float32)
    bn_mean = jnp.asarray(bn_mean, jnp.float32)
    bn_var = jnp.asarray(bn_var, jnp.float32)

    # Inference-mode BatchNorm folded into the second 1x1 conv.
    # TODO(synk): training-mode BatchNorm (batch statistics) is not implemented.
    bn_scale = bn_gamma / jnp.sqrt(bn_var + bn_eps)                 # (bot,)
    bn_shift = bn_beta - bn_mean * bn_scale
    w2eff = w2m * bn_scale[None, :]                                 # (ch, bot)
    b2eff = w2m @ bn_shift + b2f                                    # (ch,)

    # Free (metadata-only) regrouping of the input channels:
    #   combine group i = x[:, i*channels:(i+1)*channels, :]  ->  xg[:, i]
    xg = x.reshape(B, nb_input, channels, L)

    # ---- generation-aware VMEM accounting (uses the real element size) -------
    itemsize = int(jnp.dtype(x.dtype).itemsize)
    param_bytes = 4 * (nb_input * nb_input * bottleneck * channels
                       + bottleneck + channels * bottleneck + channels)
    slab_in = C_total * L * itemsize
    slab_out = channels * L * itemsize
    # double-buffered in/out slabs + double-buffered params + in-kernel temps
    # (one f32 group for pooling, one input-dtype accumulator) + fixed headroom.
    fused_need = (2 * (slab_in + slab_out) + 2 * param_bytes
                  + 4 * channels * L + itemsize * channels * L + (2 << 20))

    if (not force_tiled) and fused_need <= _VMEM_BUDGET:
        # ------------------- Path A: fused whole-slab kernel -----------------
        # Expand the first conv so it acts per (branch i, channel-group g) on the
        # per-group pooled sums, folding the PyTorch reshape(B,-1,nb) regrouping
        # and the 1/L of the average pool:
        #   w1grp[i, g, k, c] = W1[k, (g*ch + c)//nb] / L   if (g*ch + c) % nb == i
        cc = jnp.arange(C_total)
        sel = (cc[None, :] % nb_input) == jnp.arange(nb_input)[:, None]
        w1exp = (w1m[:, cc // nb_input] * (1.0 / L))[None, :, :] \
            * sel[:, None, :].astype(jnp.float32)                   # (nb, bot, C_total)
        w1grp = jnp.transpose(
            w1exp.reshape(nb_input, bottleneck, nb_input, channels),
            (0, 2, 1, 3))                                            # (nb, nb, bot, ch)
        b1c = b1f.reshape(bottleneck, 1)
        b2c = b2eff.reshape(channels, 1)

        return pl.pallas_call(
            _gate_fused_kernel,
            out_shape=jax.ShapeDtypeStruct((B, channels, L), x.dtype),
            grid_spec=pltpu.PrefetchScalarGridSpec(
                num_scalar_prefetch=0,
                grid=(B,),
                in_specs=[
                    pl.BlockSpec((pl.Squeezed(), nb_input, channels, L),
                                 lambda b: (b, 0, 0, 0)),
                    pl.BlockSpec((nb_input, nb_input, bottleneck, channels),
                                 lambda b: (0, 0, 0, 0)),
                    pl.BlockSpec((bottleneck, 1), lambda b: (0, 0)),
                    pl.BlockSpec((channels, bottleneck), lambda b: (0, 0)),
                    pl.BlockSpec((channels, 1), lambda b: (0, 0)),
                ],
                out_specs=pl.BlockSpec((pl.Squeezed(), channels, L),
                                       lambda b: (b, 0, 0)),
            ),
            compiler_params=pltpu.CompilerParams(
                dimension_semantics=("parallel",),
                vmem_limit_bytes=int(_VMEM_BUDGET),
            ),
        )(xg, w1grp, b1c, w2eff, b2c)

    # ---------------- Path B: weights precompute + L-tiled combine -----------
    # (1) Gate weights: cheap f32 pooled reduction + tiny matmuls.  jnp.mean's
    # segmented f32 reduction also fixes long-L rounding drift of a single sum.
    pooled = jnp.mean(x, axis=-1, dtype=jnp.float32)                 # (B, C_total)
    a = pooled.reshape(B, channels, nb_input)                        # reshape(B,-1,nb)
    h = jnp.einsum("kc,bci->bki", w1m, a, precision="highest") + b1f[None, :, None]
    h = jnp.maximum(h, 0.0)
    z = jnp.einsum("ck,bki->bci", w2eff, h, precision="highest") + b2eff[None, :, None]
    gate = jax.nn.softmax(z, axis=-1)                                # (B, ch, nb)
    gate_t = jnp.transpose(gate, (0, 2, 1))[..., None]               # (B, nb, ch, 1)

    # (2) L tile size: largest 128-multiple in [128, 2048] such that the
    # double-buffered in+out tiles stay well within the VMEM budget.
    if tile_l is not None:
        TL = max(128, (int(tile_l) // 128) * 128)
    else:
        per_l = (nb_input + 1) * channels * itemsize
        tile_budget = min(_VMEM_BUDGET // 2, 40 << 20)
        TL = int(max(128, min(2048, (tile_budget // (2 * per_l)) // 128 * 128)))
    TL = min(TL, ((L + 127) // 128) * 128)
    nl = pl.cdiv(L, TL)  # ragged last tile handled by Pallas block masking

    # Default double-buffering (pipeline_mode=pl.Buffered(2)) is enough: the
    # combine is vld-bound well above the HBM arrival rate.  Sweep Buffered(3)
    # only if DMA jitter shows up and VMEM headroom allows.
    return pl.pallas_call(
        _gate_combine_kernel,
        out_shape=jax.ShapeDtypeStruct((B, channels, L), x.dtype),
        grid_spec=pltpu.PrefetchScalarGridSpec(
            num_scalar_prefetch=0,
            grid=(B, nl),
            in_specs=[
                pl.BlockSpec((pl.Squeezed(), nb_input, channels, 1),
                             lambda b, l: (b, 0, 0, 0)),
                pl.BlockSpec((pl.Squeezed(), nb_input, channels, TL),
                             lambda b, l: (b, 0, 0, l)),
            ],
            out_specs=pl.BlockSpec((pl.Squeezed(), channels, TL),
                                   lambda b, l: (b, 0, l)),
        ),
        compiler_params=pltpu.CompilerParams(
            dimension_semantics=("parallel", "parallel"),
            vmem_limit_bytes=int(_VMEM_BUDGET),
        ),
    )(gate_t, xg)


def _reference_forward(x, w1, b1, bn_gamma, bn_beta, bn_mean, bn_var, w2, b2,
                       nb_input=3, bn_eps=1e-5):
    """Pure-JAX reference mirroring GateModule.forward (BatchNorm in eval mode)."""
    B, C_total, L = x.shape
    channels = C_total // nb_input
    w1m = w1.reshape(-1, channels)
    bottleneck = w1m.shape[0]
    w2m = w2.reshape(channels, bottleneck)

    pooled = jnp.mean(x, axis=-1)                                   # (B, C_total)
    a = pooled.reshape(B, channels, nb_input)                       # reshape(B,-1,nb)
    h = jnp.einsum("kc,bci->bki", w1m, a, precision="highest") + b1[None, :, None]
    h = jnp.maximum(h, 0.0)
    h = ((h - bn_mean[None, :, None])
         / jnp.sqrt(bn_var[None, :, None] + bn_eps)
         * bn_gamma[None, :, None] + bn_beta[None, :, None])
    z = jnp.einsum("ck,bki->bci", w2m, h, precision="highest") + b2[None, :, None]
    w = jax.nn.softmax(z, axis=-1)                                  # (B, ch, nb)
    xr = x.reshape(B, nb_input, channels, L)
    return jnp.einsum("bci,bicl->bcl", w, xr, precision="highest")


if __name__ == "__main__":
    key = jax.random.PRNGKey(0)
    B, channels, bottleneck, nb_input = 2, 8, 16, 3
    C_total = channels * nb_input
    ks = jax.random.split(key, 10)

    # Conv1d weights come as (out, in, kernel_size=1).
    w1 = 0.3 * jax.random.normal(ks[1], (bottleneck, channels, 1), jnp.float32)
    b1 = 0.1 * jax.random.normal(ks[2], (bottleneck,), jnp.float32)
    w2 = 0.3 * jax.random.normal(ks[3], (channels, bottleneck, 1), jnp.float32)
    b2 = 0.1 * jax.random.normal(ks[4], (channels,), jnp.float32)
    bn_gamma = 1.0 + 0.1 * jax.random.normal(ks[5], (bottleneck,), jnp.float32)
    bn_beta = 0.1 * jax.random.normal(ks[6], (bottleneck,), jnp.float32)
    bn_mean = 0.1 * jax.random.normal(ks[7], (bottleneck,), jnp.float32)
    bn_var = 0.5 + jnp.abs(jax.random.normal(ks[8], (bottleneck,), jnp.float32))
    params = (w1, b1, bn_gamma, bn_beta, bn_mean, bn_var, w2, b2)

    # --- Path A: fused whole-slab kernel, ragged L (not a multiple of 128). ---
    L = 50
    x = jax.random.normal(ks[0], (B, C_total, L), jnp.float32)
    out = jax.block_until_ready(gate_module_forward(x, *params, nb_input=nb_input))
    ref = _reference_forward(x, *params, nb_input=nb_input)
    assert out.shape == (B, channels, L)
    assert jnp.allclose(out, ref, atol=1e-3, rtol=1e-3), (
        "fused path mismatch, max abs err = "
        + str(float(jnp.max(jnp.abs(out - ref)))))

    # --- Path B: L-tiled two-pass combine, ragged last L-tile (200 vs TL=128). ---
    L2 = 200
    x2 = jax.random.normal(ks[9], (B, C_total, L2), jnp.float32)
    out2 = jax.block_until_ready(
        gate_module_forward(x2, *params, nb_input=nb_input,
                            force_tiled=True, tile_l=128))
    ref2 = _reference_forward(x2, *params, nb_input=nb_input)
    assert out2.shape == (B, channels, L2)
    assert jnp.allclose(out2, ref2, atol=1e-3, rtol=1e-3), (
        "tiled path mismatch, max abs err = "
        + str(float(jnp.max(jnp.abs(out2 - ref2)))))

    print("KERNEL_OK")
</pallas_src>

<mosaic_0001>
module attributes {stable_mosaic.version = 11 : i64} {
  func.func @_gate_fused_kernel(%arg0: i32, %arg1: memref<1x3x8x50xf32, #tpu.memory_space<vmem>>, %arg2: memref<3x3x16x8xf32, #tpu.memory_space<vmem>>, %arg3: memref<16x1xf32, #tpu.memory_space<vmem>>, %arg4: memref<8x16xf32, #tpu.memory_space<vmem>>, %arg5: memref<8x1xf32, #tpu.memory_space<vmem>>, %arg6: memref<1x8x50xf32, #tpu.memory_space<vmem>>) attributes {dimension_semantics = [#tpu.dimension_semantics<parallel>], iteration_bounds = array<i64: 2>, scalar_prefetch = 0 : i64, scratch_operands = 0 : i64, tpu.core_type = #tpu.core_type<tc>, window_params = [{transform_indices = @transform_0, window_bounds = array<i64: 1, 3, 8, 50>}, {pipeline_mode = #tpu.pipeline_mode<synchronous>, transform_indices = @transform_1, window_bounds = array<i64: 3, 3, 16, 8>}, {pipeline_mode = #tpu.pipeline_mode<synchronous>, transform_indices = @transform_2, window_bounds = array<i64: 16, 1>}, {pipeline_mode = #tpu.pipeline_mode<synchronous>, transform_indices = @transform_3, window_bounds = array<i64: 8, 16>}, {pipeline_mode = #tpu.pipeline_mode<synchronous>, transform_indices = @transform_4, window_bounds = array<i64: 8, 1>}, {transform_indices = @transform_5, window_bounds = array<i64: 1, 8, 50>}]} {
    %c0 = arith.constant 0 : index
    %c0_0 = arith.constant 0 : index
    %c0_1 = arith.constant 0 : index
    %c0_2 = arith.constant 0 : index
    %0 = vector.load %arg1[%c0, %c0_0, %c0_1, %c0_2] : memref<1x3x8x50xf32, #tpu.memory_space<vmem>>, vector<1x1x8x50xf32>
    %1 = vector.shape_cast %0 : vector<1x1x8x50xf32> to vector<8x50xf32>
    %cst = arith.constant dense<0.000000e+00> : vector<8xf32>
    %2 = vector.multi_reduction <add>, %1, %cst [1] : vector<8x50xf32> to vector<8xf32>
    %3 = vector.shape_cast %2 : vector<8xf32> to vector<8x1xf32>
    %c0_3 = arith.constant 0 : index
    %c1 = arith.constant 1 : index
    %c0_4 = arith.constant 0 : index
    %c0_5 = arith.constant 0 : index
    %4 = vector.load %arg1[%c0_3, %c1, %c0_4, %c0_5] : memref<1x3x8x50xf32, #tpu.memory_space<vmem>>, vector<1x1x8x50xf32>
    %5 = vector.shape_cast %4 : vector<1x1x8x50xf32> to vector<8x50xf32>
    %cst_6 = arith.constant dense<0.000000e+00> : vector<8xf32>
    %6 = vector.multi_reduction <add>, %5, %cst_6 [1] : vector<8x50xf32> to vector<8xf32>
    %7 = vector.shape_cast %6 : vector<8xf32> to vector<8x1xf32>
    %c0_7 = arith.constant 0 : index
    %c2 = arith.constant 2 : index
    %c0_8 = arith.constant 0 : index
    %c0_9 = arith.constant 0 : index
    %8 = vector.load %arg1[%c0_7, %c2, %c0_8, %c0_9] : memref<1x3x8x50xf32, #tpu.memory_space<vmem>>, vector<1x1x8x50xf32>
    %9 = vector.shape_cast %8 : vector<1x1x8x50xf32> to vector<8x50xf32>
    %cst_10 = arith.constant dense<0.000000e+00> : vector<8xf32>
    %10 = vector.multi_reduction <add>, %9, %cst_10 [1] : vector<8x50xf32> to vector<8xf32>
    %11 = vector.shape_cast %10 : vector<8xf32> to vector<8x1xf32>
    %c0_11 = arith.constant 0 : index
    %c0_12 = arith.constant 0 : index
    %12 = vector.load %arg3[%c0_11, %c0_12] : memref<16x1xf32, #tpu.memory_space<vmem>>, vector<16x1xf32>
    %c0_13 = arith.constant 0 : index
    %c0_14 = arith.constant 0 : index
    %c0_15 = arith.constant 0 : index
    %c0_16 = arith.constant 0 : index
    %13 = vector.load %arg2[%c0_13, %c0_14, %c0_15, %c0_16] : memref<3x3x16x8xf32, #tpu.memory_space<vmem>>, vector<1x1x16x8xf32>
    %14 = vector.shape_cast %13 : vector<1x1x16x8xf32> to vector<16x8xf32>
    %cst_17 = arith.constant dense<0.000000e+00> : vector<16x1xf32>
    %15 = tpu.matmul %14, %3, %cst_17 {dimension_numbers = #tpu.dot_dimension_numbers<[1], [0], [0], [1], [0, 0, 1, 1], [], []>} : vector<16x8xf32>, vector<8x1xf32>, vector<16x1xf32> -> vector<16x1xf32>
    %16 = arith.addf %12, %15 : vector<16x1xf32>
    %c0_18 = arith.constant 0 : index
    %c1_19 = arith.constant 1 : index
    %c0_20 = arith.constant 0 : index
    %c0_21 = arith.constant 0 : index
    %17 = vector.load %arg2[%c0_18, %c1_19, %c0_20, %c0_21] : memref<3x3x16x8xf32, #tpu.memory_space<vmem>>, vector<1x1x16x8xf32>
    %18 = vector.shape_cast %17 : vector<1x1x16x8xf32> to vector<16x8xf32>
    %cst_22 = arith.constant dense<0.000000e+00> : vector<16x1xf32>
    %19 = tpu.matmul %18, %7, %cst_22 {dimension_numbers = #tpu.dot_dimension_numbers<[1], [0], [0], [1], [0, 0, 1, 1], [], []>} : vector<16x8xf32>, vector<8x1xf32>, vector<16x1xf32> -> vector<16x1xf32>
    %20 = arith.addf %16, %19 : vector<16x1xf32>
    %c0_23 = arith.constant 0 : index
    %c2_24 = arith.constant 2 : index
    %c0_25 = arith.constant 0 : index
    %c0_26 = arith.constant 0 : index
    %21 = vector.load %arg2[%c0_23, %c2_24, %c0_25, %c0_26] : memref<3x3x16x8xf32, #tpu.memory_space<vmem>>, vector<1x1x16x8xf32>
    %22 = vector.shape_cast %21 : vector<1x1x16x8xf32> to vector<16x8xf32>
    %cst_27 = arith.constant dense<0.000000e+00> : vector<16x1xf32>
    %23 = tpu.matmul %22, %11, %cst_27 {dimension_numbers = #tpu.dot_dimension_numbers<[1], [0], [0], [1], [0, 0, 1, 1], [], []>} : vector<16x8xf32>, vector<8x1xf32>, vector<16x1xf32> -> vector<16x1xf32>
    %24 = arith.addf %20, %23 : vector<16x1xf32>
    %cst_28 = arith.constant 0.000000e+00 : f32
    %25 = vector.broadcast %cst_28 : f32 to vector<16x1xf32>
    %26 = arith.maximumf %24, %25 : vector<16x1xf32>
    %c0_29 = arith.constant 0 : index
    %c0_30 = arith.constant 0 : index
    %27 = vector.load %arg4[%c0_29, %c0_30] : memref<8x16xf32, #tpu.memory_space<vmem>>, vector<8x16xf32>
    %cst_31 = arith.constant dense<0.000000e+00> : vector<8x1xf32>
    %28 = tpu.matmul %27, %26, %cst_31 {dimension_numbers = #tpu.dot_dimension_numbers<[1], [0], [0], [1], [0, 0, 1, 1], [], []>} : vector<8x16xf32>, vector<16x1xf32>, vector<8x1xf32> -> vector<8x1xf32>
    %c0_32 = arith.constant 0 : index
    %c0_33 = arith.constant 0 : index
    %29 = vector.load %arg5[%c0_32, %c0_33] : memref<8x1xf32, #tpu.memory_space<vmem>>, vector<8x1xf32>
    %30 = arith.addf %28, %29 : vector<8x1xf32>
    %c0_34 = arith.constant 0 : index
    %c0_35 = arith.constant 0 : index
    %31 = vector.load %arg3[%c0_34, %c0_35] : memref<16x1xf32, #tpu.memory_space<vmem>>, vector<16x1xf32>
    %c1_36 = arith.constant 1 : index
    %c0_37 = arith.constant 0 : index
    %c0_38 = arith.constant 0 : index
    %c0_39 = arith.constant 0 : index
    %32 = vector.load %arg2[%c1_36, %c0_37, %c0_38, %c0_39] : memref<3x3x16x8xf32, #tpu.memory_space<vmem>>, vector<1x1x16x8xf32>
    %33 = vector.shape_cast %32 : vector<1x1x16x8xf32> to vector<16x8xf32>
    %cst_40 = arith.constant dense<0.000000e+00> : vector<16x1xf32>
    %34 = tpu.matmul %33, %3, %cst_40 {dimension_numbers = #tpu.dot_dimension_numbers<[1], [0], [0], [1], [0, 0, 1, 1], [], []>} : vector<16x8xf32>, vector<8x1xf32>, vector<16x1xf32> -> vector<16x1xf32>
    %35 = arith.addf %31, %34 : vector<16x1xf32>
    %c1_41 = arith.constant 1 : index
    %c1_42 = arith.constant 1 : index
    %c0_43 = arith.constant 0 : index
    %c0_44 = arith.constant 0 : index
    %36 = vector.load %arg2[%c1_41, %c1_42, %c0_43, %c0_44] : memref<3x3x16x8xf32, #tpu.memory_space<vmem>>, vector<1x1x16x8xf32>
    %37 = vector.shape_cast %36 : vector<1x1x16x8xf32> to vector<16x8xf32>
    %cst_45 = arith.constant dense<0.000000e+00> : vector<16x1xf32>
    %38 = tpu.matmul %37, %7, %cst_45 {dimension_numbers = #tpu.dot_dimension_numbers<[1], [0], [0], [1], [0, 0, 1, 1], [], []>} : vector<16x8xf32>, vector<8x1xf32>, vector<16x1xf32> -> vector<16x1xf32>
    %39 = arith.addf %35, %38 : vector<16x1xf32>
    %c1_46 = arith.constant 1 : index
    %c2_47 = arith.constant 2 : index
    %c0_48 = arith.constant 0 : index
    %c0_49 = arith.constant 0 : index
    %40 = vector.load %arg2[%c1_46, %c2_47, %c0_48, %c0_49] : memref<3x3x16x8xf32, #tpu.memory_space<vmem>>, vector<1x1x16x8xf32>
    %41 = vector.shape_cast %40 : vector<1x1x16x8xf32> to vector<16x8xf32>
    %cst_50 = arith.constant dense<0.000000e+00> : vector<16x1xf32>
    %42 = tpu.matmul %41, %11, %cst_50 {dimension_numbers = #tpu.dot_dimension_numbers<[1], [0], [0], [1], [0, 0, 1, 1], [], []>} : vector<16x8xf32>, vector<8x1xf32>, vector<16x1xf32> -> vector<16x1xf32>
    %43 = arith.addf %39, %42 : vector<16x1xf32>
    %cst_51 = arith.constant 0.000000e+00 : f32
    %44 = vector.broadcast %cst_51 : f32 to vector<16x1xf32>
    %45 = arith.maximumf %43, %44 : vector<16x1xf32>
    %c0_52 = arith.constant 0 : index
    %c0_53 = arith.constant 0 : index
    %46 = vector.load %arg4[%c0_52, %c0_53] : memref<8x16xf32, #tpu.memory_space<vmem>>, vector<8x16xf32>
    %cst_54 = arith.constant dense<0.000000e+00> : vector<8x1xf32>
    %47 = tpu.matmul %46, %45, %cst_54 {dimension_numbers = #tpu.dot_dimension_numbers<[1], [0], [0], [1], [0, 0, 1, 1], [], []>} : vector<8x16xf32>, vector<16x1xf32>, vector<8x1xf32> -> vector<8x1xf32>
    %c0_55 = arith.constant 0 : index
    %c0_56 = arith.constant 0 : index
    %48 = vector.load %arg5[%c0_55, %c0_56] : memref<8x1xf32, #tpu.memory_space<vmem>>, vector<8x1xf32>
    %49 = arith.addf %47, %48 : vector<8x1xf32>
    %c0_57 = arith.constant 0 : index
    %c0_58 = arith.constant 0 : index
    %50 = vector.load %arg3[%c0_57, %c0_58] : memref<16x1xf32, #tpu.memory_space<vmem>>, vector<16x1xf32>
    %c2_59 = arith.constant 2 : index
    %c0_60 = arith.constant 0 : index
    %c0_61 = arith.constant 0 : index
    %c0_62 = arith.constant 0 : index
    %51 = vector.load %arg2[%c2_59, %c0_60, %c0_61, %c0_62] : memref<3x3x16x8xf32, #tpu.memory_space<vmem>>, vector<1x1x16x8xf32>
    %52 = vector.shape_cast %51 : vector<1x1x16x8xf32> to vector<16x8xf32>
    %cst_63 = arith.constant dense<0.000000e+00> : vector<16x1xf32>
    %53 = tpu.matmul %52, %3, %cst_63 {dimension_numbers = #tpu.dot_dimension_numbers<[1], [0], [0], [1], [0, 0, 1, 1], [], []>} : vector<16x8xf32>, vector<8x1xf32>, vector<16x1xf32> -> vector<16x1xf32>
    %54 = arith.addf %50, %53 : vector<16x1xf32>
    %c2_64 = arith.constant 2 : index
    %c1_65 = arith.constant 1 : index
    %c0_66 = arith.constant 0 : index
    %c0_67 = arith.constant 0 : index
    %55 = vector.load %arg2[%c2_64, %c1_65, %c0_66, %c0_67] : memref<3x3x16x8xf32, #tpu.memory_space<vmem>>, vector<1x1x16x8xf32>
    %56 = vector.shape_cast %55 : vector<1x1x16x8xf32> to vector<16x8xf32>
    %cst_68 = arith.constant dense<0.000000e+00> : vector<16x1xf32>
    %57 = tpu.matmul %56, %7, %cst_68 {dimension_numbers = #tpu.dot_dimension_numbers<[1], [0], [0], [1], [0, 0, 1, 1], [], []>} : vector<16x8xf32>, vector<8x1xf32>, vector<16x1xf32> -> vector<16x1xf32>
    %58 = arith.addf %54, %57 : vector<16x1xf32>
    %c2_69 = arith.constant 2 : index
    %c2_70 = arith.constant 2 : index
    %c0_71 = arith.constant 0 : index
    %c0_72 = arith.constant 0 : index
    %59 = vector.load %arg2[%c2_69, %c2_70, %c0_71, %c0_72] : memref<3x3x16x8xf32, #tpu.memory_space<vmem>>, vector<1x1x16x8xf32>
    %60 = vector.shape_cast %59 : vector<1x1x16x8xf32> to vector<16x8xf32>
    %cst_73 = arith.constant dense<0.000000e+00> : vector<16x1xf32>
    %61 = tpu.matmul %60, %11, %cst_73 {dimension_numbers = #tpu.dot_dimension_numbers<[1], [0], [0], [1], [0, 0, 1, 1], [], []>} : vector<16x8xf32>, vector<8x1xf32>, vector<16x1xf32> -> vector<16x1xf32>
    %62 = arith.addf %58, %61 : vector<16x1xf32>
    %cst_74 = arith.constant 0.000000e+00 : f32
    %63 = vector.broadcast %cst_74 : f32 to vector<16x1xf32>
    %64 = arith.maximumf %62, %63 : vector<16x1xf32>
    %c0_75 = arith.constant 0 : index
    %c0_76 = arith.constant 0 : index
    %65 = vector.load %arg4[%c0_75, %c0_76] : memref<8x16xf32, #tpu.memory_space<vmem>>, vector<8x16xf32>
    %cst_77 = arith.constant dense<0.000000e+00> : vector<8x1xf32>
    %66 = tpu.matmul %65, %64, %cst_77 {dimension_numbers = #tpu.dot_dimension_numbers<[1], [0], [0], [1], [0, 0, 1, 1], [], []>} : vector<8x16xf32>, vector<16x1xf32>, vector<8x1xf32> -> vector<8x1xf32>
    %c0_78 = arith.constant 0 : index
    %c0_79 = arith.constant 0 : index
    %67 = vector.load %arg5[%c0_78, %c0_79] : memref<8x1xf32, #tpu.memory_space<vmem>>, vector<8x1xf32>
    %68 = arith.addf %66, %67 : vector<8x1xf32>
    %69 = arith.maximumf %30, %49 : vector<8x1xf32>
    %70 = arith.maximumf %69, %68 : vector<8x1xf32>
    %71 = arith.subf %30, %70 : vector<8x1xf32>
    %72 = math.exp %71 : vector<8x1xf32>
    %73 = arith.subf %49, %70 : vector<8x1xf32>
    %74 = math.exp %73 : vector<8x1xf32>
    %75 = arith.subf %68, %70 : vector<8x1xf32>
    %76 = math.exp %75 : vector<8x1xf32>
    %77 = arith.addf %72, %74 : vector<8x1xf32>
    %78 = arith.addf %77, %76 : vector<8x1xf32>
    %cst_80 = arith.constant 1.000000e+00 : f32
    %79 = vector.broadcast %cst_80 : f32 to vector<8x1xf32>
    %80 = arith.divf %79, %78 : vector<8x1xf32>
    %81 = arith.mulf %72, %80 : vector<8x1xf32>
    %c0_81 = arith.constant 0 : index
    %c0_82 = arith.constant 0 : index
    %c0_83 = arith.constant 0 : index
    %c0_84 = arith.constant 0 : index
    %82 = vector.load %arg1[%c0_81, %c0_82, %c0_83, %c0_84] : memref<1x3x8x50xf32, #tpu.memory_space<vmem>>, vector<1x1x8x50xf32>
    %83 = vector.shape_cast %82 : vector<1x1x8x50xf32> to vector<8x50xf32>
    %84 = vector.broadcast %81 : vector<8x1xf32> to vector<8x50xf32>
    %85 = arith.mulf %84, %83 : vector<8x50xf32>
    %86 = arith.mulf %74, %80 : vector<8x1xf32>
    %c0_85 = arith.constant 0 : index
    %c1_86 = arith.constant 1 : index
    %c0_87 = arith.constant 0 : index
    %c0_88 = arith.constant 0 : index
    %87 = vector.load %arg1[%c0_85, %c1_86, %c0_87, %c0_88] : memref<1x3x8x50xf32, #tpu.memory_space<vmem>>, vector<1x1x8x50xf32>
    %88 = vector.shape_cast %87 : vector<1x1x8x50xf32> to vector<8x50xf32>
    %89 = vector.broadcast %86 : vector<8x1xf32> to vector<8x50xf32>
    %90 = arith.mulf %89, %88 : vector<8x50xf32>
    %91 = arith.addf %85, %90 : vector<8x50xf32>
    %92 = arith.mulf %76, %80 : vector<8x1xf32>
    %c0_89 = arith.constant 0 : index
    %c2_90 = arith.constant 2 : index
    %c0_91 = arith.constant 0 : index
    %c0_92 = arith.constant 0 : index
    %93 = vector.load %arg1[%c0_89, %c2_90, %c0_91, %c0_92] : memref<1x3x8x50xf32, #tpu.memory_space<vmem>>, vector<1x1x8x50xf32>
    %94 = vector.shape_cast %93 : vector<1x1x8x50xf32> to vector<8x50xf32>
    %95 = vector.broadcast %92 : vector<8x1xf32> to vector<8x50xf32>
    %96 = arith.mulf %95, %94 : vector<8x50xf32>
    %97 = arith.addf %91, %96 : vector<8x50xf32>
    %c0_93 = arith.constant 0 : index
    %c0_94 = arith.constant 0 : index
    %c0_95 = arith.constant 0 : index
    %98 = vector.load %arg6[%c0_93, %c0_94, %c0_95] : memref<1x8x50xf32, #tpu.memory_space<vmem>>, vector<1x8x50xf32>
    %99 = vector.shape_cast %98 : vector<1x8x50xf32> to vector<8x50xf32>
    %100 = vector.shape_cast %97 : vector<8x50xf32> to vector<1x8x50xf32>
    tpu.vector_store %arg6[%c0_93, %c0_94, %c0_95], %100 {strides = array<i32>} : memref<1x8x50xf32, #tpu.memory_space<vmem>>, vector<1x8x50xf32>,
    return
  }
  func.func @transform_0(%arg0: i32) -> (i32, i32, i32, i32) {
    %c0_i32 = arith.constant 0 : i32
    %c0_i32_0 = arith.constant 0 : i32
    %c0_i32_1 = arith.constant 0 : i32
    %c0_i32_2 = arith.constant 0 : i32
    return %arg0, %c0_i32, %c0_i32_0, %c0_i32_1 : i32, i32, i32, i32
  }
  func.func @transform_1(%arg0: i32) -> (i32, i32, i32, i32) {
    %c0_i32 = arith.constant 0 : i32
    %c0_i32_0 = arith.constant 0 : i32
    %c0_i32_1 = arith.constant 0 : i32
    %c0_i32_2 = arith.constant 0 : i32
    %c0_i32_3 = arith.constant 0 : i32
    return %c0_i32, %c0_i32_0, %c0_i32_1, %c0_i32_2 : i32, i32, i32, i32
  }
  func.func @transform_2(%arg0: i32) -> (i32, i32) {
    %c0_i32 = arith.constant 0 : i32
    %c0_i32_0 = arith.constant 0 : i32
    %c0_i32_1 = arith.constant 0 : i32
    return %c0_i32, %c0_i32_0 : i32, i32
  }
  func.func @transform_3(%arg0: i32) -> (i32, i32) {
    %c0_i32 = arith.constant 0 : i32
    %c0_i32_0 = arith.constant 0 : i32
    %c0_i32_1 = arith.constant 0 : i32
    return %c0_i32, %c0_i32_0 : i32, i32
  }
  func.func @transform_4(%arg0: i32) -> (i32, i32) {
    %c0_i32 = arith.constant 0 : i32
    %c0_i32_0 = arith.constant 0 : i32
    %c0_i32_1 = arith.constant 0 : i32
    return %c0_i32, %c0_i32_0 : i32, i32
  }
  func.func @transform_5(%arg0: i32) -> (i32, i32, i32) {
    %c0_i32 = arith.constant 0 : i32
    %c0_i32_0 = arith.constant 0 : i32
    %c0_i32_1 = arith.constant 0 : i32
    return %arg0, %c0_i32, %c0_i32_0 : i32, i32, i32
  }
}

</mosaic_0001>

<bundles_post_ra>
// kernel: gate_module_forward.1
= control target key start
LH: loop header
LB: loop body
LE: loop exit
PB: predicated region body
PF: predicated region fallthrough
CT: control target
= control target key end

     0   :  { %10 = vsyncpa [#allocation3], 0  ;;  %s1144_s0 = inlined_call_operand.vmem [shape: f32[2,3,8,50], index: 0, kind: input, shape index: {}]   ;;  %s1145_s1 = inlined_call_operand.vmem [shape: f32[3,3,16,8], index: 1, kind: input, shape index: {}]   ;;  %s1146_s2 = inlined_call_operand.vmem [shape: f32[16,1], index: 2, kind: input, shape index: {}]   ;;  %s1147_s3 = inlined_call_operand.vmem [shape: f32[8,16], index: 3, kind: input, shape index: {}]   ;;  %s1148_s4 = inlined_call_operand.vmem [shape: f32[8,1], index: 4, kind: input, shape index: {}]   ;;  %s1149_s5 = inlined_call_operand.hbm [shape: f32[2,8,50], index: 5, kind: output, shape index: {}]  }
   0x1   :  { %12 = vsyncpa [#allocation3 + $0x1], 0  ;;  %s941_s18 = smov 0   ;;  %s943_s19 = smov 0  }
   0x2   :  { %s945_s20 = smov 0   ;;  %s947_s21 = smov 0  }
   0x3 LB: > { %s962_s22 = sadd.s32 4294967295, %s908_s21   ;;  %s745_s23 = sadd.s32 4294967294, %s908_s21   ;;  %s908_s21 = sphi %s947_s21, %s1155_s21   ;;  %s904_s20 = sphi %s945_s20, %s1154_s20   ;;  %s900_s19 = sphi %s943_s19, %s1153_s19   ;;  %s896_s18 = sphi %s941_s18, %s1152_s18  }
   0x4   : > { %s966_s24 = sadd.s32 1, %s908_s21   ;;  %s135_s25 = sadd.s32 1, %s904_s20 }
   0x5   : > { %s132_s26 = ssub.s32 %s908_s21, %s966_s24  ;;  %p145_p0 = scmp.ne.s32.totalorder %s904_s20, %s900_s19 }
   0x6   : > { %p133_p1 = scmp.eq.s32.totalorder %s132_s26, 0  ;;  %p146_p2 = scmp.eq.s32.totalorder %s962_s22, 1 }
   0x7   : > { %p151_p3 = scmp.ne.s32.totalorder %s900_s19, %s896_s18  ;;  %p152_p4 = scmp.eq.s32.totalorder %s745_s23, 1 }
   0x8   : > { %s977_s27 = scalar_select %p133_p1, %s904_s20, %s135_s25  }
   0x9   : > { %p979_p5 = por %p146_p2, %p145_p0  ;;  %p983_p6 = por %p152_p4, %p151_p3 }
   0xa   : > { %p748_p7 = scmp.ge.s32.totalorder %s908_s21, 1  ;;  %p190_p8 = scmp.lt.s32.totalorder %s908_s21, 3 }
   0xc   : > { %p191_p9 = pnand %p748_p7, %p190_p8 }
   0xd   : > { %p218_p10 = scmp.lt.s32.totalorder (!%p191_p9), %s962_s22, 1  ;;  %s791_s8 = sshll.u32 (!%p191_p9), %s962_s22, 3 }
   0xe   : > { %194 = sbr.rel (%p191_p9) target bundleno = 903 (0x387), region = 40  ;;  %s681_s11 = scalar_lea.hbm (!%p191_p9), %s1149_s5, %s791_s8 }
   0xf   : > { %s685_s14 = sshll.u32 (!%p191_p9), %s681_s11, 4  ;;  %s866_s25 = scalar_lea.hbm (!%p191_p9), %s1149_s5, 16  ;;  %s686_s14 = int_to_ptr.hbm [resolvable:$true] %s685_s14 }
  0x10   : > { %s860_s15 = sshra.s32 (!%p191_p9), %s686_s14, 4  ;;  %s861_s15 = int_to_ptr.hbm [resolvable:$true] %s860_s15 }
  0x11   : > { %s862_s16 = scalar_lea.hbm (!%p191_p9), %s861_s15, 8  ;;  %p867_p0 = scmp.lt.s32.totalorder (!%p191_p9), %s861_s15, %s1149_s5 }
  0x12   : > { %p863_p11 = scmp.ne.s32.totalorder (!%p191_p9), %s861_s15, %s862_s16  ;;  %p868_p1 = scmp.lt.s32.totalorder (!%p191_p9), %s866_s25, %s862_s16 }
  0x13   : > { %s219_s30 = scalar_select %p218_p10, %s962_s22, 1  ;;  %vm224_vm0 = vcmask 408576   ;;  %vm242_vm1 = vcmask 64512   ;;  %v759_v6 = vld [vmem:[%s1145_s1 + $0x20] sm:$0xff]  ;;  %v755_v9 = vld [vmem:[%s1145_s1 + $0x10] sm:$0xff]  ;;  %v760_v11 = vld [vmem:[%s1145_s1 + $0x28] sm:$0xff] }
  0x14   : > { %v240_v10 = vld [vmem:[%s1145_s1] sm:$0xff]  ;;  %v756_v13 = vld [vmem:[%s1145_s1 + $0x18] sm:$0xff]  ;;  %v241_v14 = vld [vmem:[%s1145_s1 + $0x8] sm:$0xff]  ;;  %vm346_vm2 = vcmask 130048   ;;  %p864_p12 = pnand %p863_p11, %p979_p5  ;;  %p869_p2 = por %p868_p1, %p867_p0 }
  0x15   : > { %s794_s6 = smul.u32 24, %s219_s30  ;;  %v1036_v18 = vld [vmem:[%s1146_s2] sm:$0xff]  ;;  %v772_v20 = vld [vmem:[%s1145_s1 + $0x50] sm:$0xff]  ;;  %v1050_v22 = vld [vmem:[%s1146_s2 + $0x8] sm:$0xff] }
  0x16   : > { %v768_v19 = vld [vmem:[%s1145_s1 + $0x40] sm:$0xff]  ;;  %v769_v28 = vld [vmem:[%s1145_s1 + $0x48] sm:$0xff]  ;;  %v773_v29 = vld [vmem:[%s1145_s1 + $0x58] sm:$0xff]  ;;  %p865_p13 = pneg %p864_p12 }
  0x17   : > { %s222_s9 = scalar_lea.vmem %s1144_s0, %s794_s6  ;;  %v344_v35 = vld [vmem:[%s1147_s3] sm:$0xff]  ;;  %v764_v36 = vld [vmem:[%s1145_s1 + $0x30] sm:$0xff]  ;;  %v765_v37 = vld [vmem:[%s1145_s1 + $0x38] sm:$0xff]  ;;  %s215_s6 = sand.u32 1, %s900_s19  }
  0x18   : > { %v994_v0 = vld [vmem:[%s222_s9 + $0x10] sm:$0xff]  ;;  %v996_v1 = vld [vmem:[%s222_s9 + $0x8] sm:$0xff]  ;;  %v1002_v4 = vld [vmem:[%s222_s9] sm:$0xff]  ;;  %s749_s7 = sshll.u32 %s215_s6, 3  ;;  %s671_s22 = scalar_lea.sflag [#allocation3], %s215_s6 }
  0x19   : > { %v235_v2 = vsel %vm224_vm0, %v994_v0, 0.0  ;;  %v230_v3 = vsel %vm224_vm0, %v996_v1, 0.0  ;;  %v225_v5 = vsel %vm224_vm0, %v1002_v4, 0.0  ;;  %v781_v39 = vld [vmem:[%s1145_s1 + $0x70] sm:$0xff]  ;;  %v782_v43 = vld [vmem:[%s1145_s1 + $0x78] sm:$0xff]  ;;  %v785_v44 = vld [vmem:[%s1145_s1 + $0x80] sm:$0xff]  ;;  %p870_p3 = pnand %p869_p2, %p865_p13 }
  0x1a   : > { %236 = vadd.xlane.f32.xlu0 %v235_v2  ;;  %231 = vadd.xlane.f32.xlu1 %v230_v3  ;;  %v786_v51 = vld [vmem:[%s1145_s1 + $0x88] sm:$0xff]  ;;  %v777_v57 = vld [vmem:[%s1145_s1 + $0x60] sm:$0xff]  ;;  %s217_s12 = scalar_lea.vmem [#allocation2], %s749_s7 }
  0x1b   : > { %v778_v58 = vld [vmem:[%s1145_s1 + $0x68] sm:$0xff]  ;;  %v345_v59 = vld [vmem:[%s1148_s4] sm:$0xff]  ;;  %s683_s13 = sshll.u32 %s217_s12, 4  ;;  %s684_s13 = int_to_ptr.vmem [resolvable:$true] %s683_s13 }
  0x22   : > { %226 = vadd.xlane.f32.xlu0 %v225_v5 }
  0x8d   : > { %v237_v7 = vpop.xlane.xlu0 %236  ;;  %v232_v8 = vpop.xlane.xlu1 %231 }
  0x8e   : > { %298 = vmatpush.msra.mxu1 %v232_v8  ;;  %332 = vmatpush.msra.mxu2 %v237_v7 }
  0x8f   : > { %761 = vmatmul.msk.f32.vlgmr.msra.gmra.mxu2 %vm242_vm1, %v759_v6  ;;  %757 = vmatmul.msk.f32.vlgmr.msra.gmra.mxu1 %vm242_vm1, %v755_v9 }
  0x90   : > { %462 = vmatpush.msrb.mxu1 %v237_v7 }
  0x95   : > { %v1020_v12 = vpop.xlane.xlu0 %226 }
  0x96   : > { %264 = vmatpush.msra.mxu0 %v1020_v12 }
  0x97   : > { %753 = vmatmul.msk.f32.vlgmr.msra.gmra.mxu0 %vm242_vm1, %v240_v10  ;;  %762 = vmatmul.msk.f32.gmra.mxu2 %vm242_vm1, %v760_v11 }
  0x98   : > { %428 = vmatpush.msrb.mxu0 %v232_v8  ;;  %758 = vmatmul.msk.f32.gmra.mxu1 %vm242_vm1, %v756_v13 }
  0x9a   : > { %586 = vmatpush.msra.mxu0 %v237_v7 }
  0x9f   : > { %754 = vmatmul.msk.f32.gmra.mxu0 %vm242_vm1, %v241_v14 }
  0xa0   : > { %774 = vmatmul.msk.f32.vlgmr.msrb.gmra.mxu1 %vm242_vm1, %v772_v20 }
  0xa7   : > { %770 = vmatmul.msk.f32.vlgmr.msrb.gmra.mxu0 %vm242_vm1, %v768_v19 }
  0xa8   : > { %775 = vmatmul.msk.f32.gmra.mxu1 %vm242_vm1, %v773_v29 }
  0xaf   : > { %771 = vmatmul.msk.f32.gmra.mxu0 %vm242_vm1, %v769_v28 }
  0xb7   : > { %787 = vmatmul.msk.f32.vlgmr.msra.gmra.mxu0 %vm242_vm1, %v785_v44 }
  0xbf   : > { %788 = vmatmul.msk.f32.gmra.mxu0 %vm242_vm1, %v786_v51 }
 0x10c   : > { %v300_v15 = vpop.f32.mrf.mxu1 }
 0x112   : > { %v334_v17 = vpop.f32.mrf.mxu2 }
 0x114   : > { %v266_v16 = vpop.f32.mrf.mxu0 }
 0x115   : > { %v272_v21 = vadd.f32 %v266_v16, %v1036_v18  ;;  %v303_v24 = vpop.f32.mrf.mxu1 }
 0x117   : > { %v306_v25 = vadd.f32 %v300_v15, %v272_v21 }
 0x119   : > { %v340_v31 = vadd.f32 %v334_v17, %v306_v25  ;;  %v910_v17 = vmov 0  }
 0x11a   : > { %v337_v27 = vpop.f32.mrf.mxu2  ;;  %836 = vset.pattern.permute.xlu2 %v910_v17  ;;  %835 = vset.pattern.permute.xlu1 %v910_v17 }
 0x11b   : > { %v342_v34 = vmax.f32 %v340_v31, 0.0  ;;  %837 = vset.pattern.permute.xlu0 %v910_v17 }
 0x11c   : > { %v269_v23 = vpop.f32.mrf.mxu0 }
 0x11d   : > { %v273_v26 = vadd.f32 %v269_v23, %v1050_v22  ;;  %v464_v42 = vpop.f32.mrf.mxu1 }
 0x11f   : > { %v307_v30 = vadd.f32 %v303_v24, %v273_v26 }
 0x121   : > { %v341_v32 = vadd.f32 %v337_v27, %v307_v30 }
 0x123   : > { %v343_v33 = vmax.f32 %v341_v32, 0.0 }
 0x124   : > { %v430_v40 = vpop.f32.mrf.mxu0 }
 0x125   : > { %364 = vmatpush.msra.mxu3 %v343_v33  ;;  %v467_v50 = vpop.f32.mrf.mxu1 }
 0x127   : > { %365 = vmatpush.msra.mxu3 %v342_v34 }
 0x128   : > { %763 = vmatmul.msk.f32.vlgmr.msra.gmra.mxu3 %vm346_vm2, %v344_v35 }
 0x129   : > { %394 = vmatpush.msrb.mxu3 %v1020_v12 }
 0x12b   : > { %552 = vmatpush.msra.mxu3 %v232_v8 }
 0x12c   : > { %v433_v47 = vpop.f32.mrf.mxu0 }
 0x130   : > { %766 = vmatmul.msk.f32.vlgmr.msrb.gmra.mxu3 %vm242_vm1, %v764_v36 }
 0x134   : > { %v588_v5 = vpop.f32.mrf.mxu0 }
 0x138   : > { %767 = vmatmul.msk.f32.gmra.mxu3 %vm242_vm1, %v765_v37 }
 0x13c   : > { %v591_v11 = vpop.f32.mrf.mxu0 }
 0x140   : > { %783 = vmatmul.msk.f32.vlgmr.msra.gmra.mxu3 %vm242_vm1, %v781_v39 }
 0x148   : > { %784 = vmatmul.msk.f32.gmra.mxu3 %vm242_vm1, %v782_v43 }
 0x1ab   : > { %v367_v38 = vpop.f32.mrf.mxu3 }
 0x1ac   : > { %v368_v61 = vadd.f32 %v367_v38, %v345_v59 }
 0x1b3   : > { %v396_v41 = vpop.f32.mrf.mxu3 }
 0x1b4   : > { %v402_v45 = vadd.f32 %v396_v41, %v1036_v18 }
 0x1b6   : > { %v436_v48 = vadd.f32 %v430_v40, %v402_v45 }
 0x1b8   : > { %v470_v53 = vadd.f32 %v464_v42, %v436_v48 }
 0x1ba   : > { %v472_v56 = vmax.f32 %v470_v53, 0.0 }
 0x1bb   : > { %v399_v46 = vpop.f32.mrf.mxu3 }
 0x1bc   : > { %v403_v49 = vadd.f32 %v399_v46, %v1050_v22 }
 0x1be   : > { %v437_v52 = vadd.f32 %v433_v47, %v403_v49 }
 0x1c0   : > { %v471_v54 = vadd.f32 %v467_v50, %v437_v52 }
 0x1c2   : > { %v473_v55 = vmax.f32 %v471_v54, 0.0 }
 0x1c3   : > { %v554_v2 = vpop.f32.mrf.mxu3 }
 0x1c4   : > { %488 = vmatpush.msrb.mxu2 %v473_v55 }
 0x1c6   : > { %489 = vmatpush.msrb.mxu2 %v472_v56 }
 0x1c7   : > { %776 = vmatmul.msk.f32.vlgmr.msrb.gmra.mxu2 %vm346_vm2, %v344_v35 }
 0x1c8   : > { %518 = vmatpush.msra.mxu2 %v1020_v12 }
 0x1cb   : > { %v557_v8 = vpop.f32.mrf.mxu3 }
 0x1cf   : > { %779 = vmatmul.msk.f32.vlgmr.msra.gmra.mxu2 %vm242_vm1, %v777_v57 }
 0x1d7   : > { %780 = vmatmul.msk.f32.gmra.mxu2 %vm242_vm1, %v778_v58 }
 0x24a   : > { %v491_v60 = vpop.f32.mrf.mxu2 }
 0x24b   : > { %v492_v62 = vadd.f32 %v491_v60, %v345_v59 }
 0x24d   : > { %v618_v63 = vmax.f32 %v368_v61, %v492_v62 }
 0x252   : > { %v520_v3 = vpop.f32.mrf.mxu2 }
 0x253   : > { %v526_v6 = vadd.f32 %v520_v3, %v1036_v18 }
 0x255   : > { %v560_v9 = vadd.f32 %v554_v2, %v526_v6 }
 0x257   : > { %v594_v13 = vadd.f32 %v588_v5, %v560_v9 }
 0x259   : > { %v596_v16 = vmax.f32 %v594_v13, 0.0 }
 0x25a   : > { %v523_v7 = vpop.f32.mrf.mxu2 }
 0x25b   : > { %v527_v10 = vadd.f32 %v523_v7, %v1050_v22 }
 0x25d   : > { %v561_v12 = vadd.f32 %v557_v8, %v527_v10 }
 0x25f   : > { %v595_v14 = vadd.f32 %v591_v11, %v561_v12 }
 0x261   : > { %v597_v15 = vmax.f32 %v595_v14, 0.0 }
 0x263   : > { %612 = vmatpush.msra.mxu1 %v597_v15 }
 0x265   : > { %613 = vmatpush.msra.mxu1 %v596_v16 }
 0x266   : > { %789 = vmatmul.msk.f32.vlgmr.msra.gmra.mxu1 %vm346_vm2, %v344_v35 }
 0x2e3   : > { %v615_v18 = vpop.f32.mrf.mxu1 }
 0x2e4   : > { %v616_v19 = vadd.f32 %v615_v18, %v345_v59 }
 0x2e6   : > { %v619_v20 = vmax.f32 %v618_v63, %v616_v19 }
 0x2e8   : > { %v620_v21 = vsub.f32 %v368_v61, %v619_v20  ;;  %v623_v23 = vsub.f32 %v492_v62, %v619_v20  ;;  %v626_v22 = vsub.f32 %v616_v19, %v619_v20 }
 0x2ea   : > { %v621_v24 = vmul.f32 1.442695, %v620_v21  ;;  %v624_v25 = vmul.f32 1.442695, %v623_v23  ;;  %v627_v26 = vmul.f32 1.442695, %v626_v22 }
 0x2ec   : > { %838 = vpow2.f32 %v621_v24 }
 0x2ed   : > { %840 = vpow2.f32 %v624_v25 }
 0x2ee   : > { %842 = vpow2.f32 %v627_v26 }
 0x2f2   : > { %v839_v27 = vpop.eup %838 }
 0x2f3   : > { %v841_v28 = vpop.eup %840 }
 0x2f4   : > { %v629_v29 = vadd.f32 %v841_v28, %v839_v27  ;;  %v843_v30 = vpop.eup %842 }
 0x2f6   : > { %v630_v31 = vadd.f32 %v843_v30, %v629_v29 }
 0x2f8   : > { %844 = vrcp.f32 %v630_v31  ;;  %v642_v35 = vand.u32 2147483648, %v630_v31  ;;  %v640_v37 = vand.u32 2147483647, %v630_v31  ;;  %vm636_vm4 = vweird.f32 %v630_v31 }
 0x2fa   : > { %v643_v39 = vor.u32 1.1754944e-38, %v642_v35  ;;  %vm641_vm6 = vcmp.eq.f32.partialorder %v640_v37, 8.507059e+37 }
 0x2fe   : > { %v845_v32 = vpop.eup %844 }
 0x2ff   : > { %v632_v33 = vmul.f32 %v845_v32, %v630_v31  ;;  %vm637_vm3 = vweird.f32 %v845_v32 }
 0x300   : > { %vm638_vm5 = vmor %vm636_vm4, %vm637_vm3 }
 0x301   : > { %v633_v34 = vsub.f32 1.0, %v632_v33 }
 0x303   : > { %v634_v36 = vmul.f32 %v845_v32, %v633_v34 }
 0x305   : > { %v635_v38 = vadd.f32 %v845_v32, %v634_v36 }
 0x307   : > { %v639_v40 = vsel %vm638_vm5, %v845_v32, %v635_v38 }
 0x308   : > { %v644_v41 = vsel %vm641_vm6, %v643_v39, %v639_v40 }
 0x309   : > { %v653_v42 = vmul.f32 %v841_v28, %v644_v41  ;;  %v646_v43 = vmul.f32 %v839_v27, %v644_v41  ;;  %v661_v44 = vmul.f32 %v843_v30, %v644_v41 }
 0x30b   : > { %656 = vperm.xlu2 %836, %v653_v42   ;;  %649 = vperm.xlu1 %835, %v646_v43  }
 0x313   : > { %664 = vperm.xlu2 %836, %v661_v44  }
 0x365   : > { %v657_v45 = vpop.permute.xlu2 %656 }
 0x366   : > { %v659_v48 = vmul.f32 %v996_v1, %v657_v45 }
 0x36d   : > { %v665_v46 = vpop.permute.xlu2 %664 }
 0x36e   : > { %v667_v50 = vmul.f32 %v994_v0, %v665_v46 }
 0x37d   : > { %v650_v47 = vpop.permute.xlu1 %649 }
 0x37e   : > { %v652_v49 = vmul.f32 %v650_v47, %v1002_v4 }
 0x380   : > { %v660_v51 = vadd.f32 %v659_v48, %v652_v49 }
 0x382   : > { %v668_v52 = vadd.f32 %v667_v50, %v660_v51 }
 0x384   : > { %669 = vst.msk [vmem:[%s217_s12] sm:$0xff] %vm224_vm0, %v668_v52 }
 0x385   : > { %873 = shalt.err (!%p870_p3)
}
 0x386   : > { %795 = dma.vmem_to_hbm [thread:$0]  (%p979_p5), %s684_s13, 128, %s686_s14, %s671_s22  }
 0x387 PF: > { %p801_p4 = scmp.ge.s32.totalorder %s908_s21, 2  ;;  %s697_s6 = sand.u32 1, %s896_s18  }
 0x388   : > { %s698_s7 = scalar_lea.sflag [#allocation3], %s697_s6 }
 0x389   : > { %p798_p7 = pnand %p801_p4, %p983_p6 }
 0x38b   : > { %p799_p8 = pneg %p798_p7 }
 0x38d   : > { %891 = dma.done.wait (%p799_p8), %s698_s7, 128  }
 0x38e   : > { %893 = vsyncadd (%p799_p8), %s698_s7, 4294967168  ;;  %p15_p9 = scmp.ge.s32.totalorder %s966_s24, 4   ;;  %s1152_s18 = smov %s900_s19 }
 0x38f   : > { %s1153_s19 = smov %s904_s20  ;;  %s1154_s20 = smov %s977_s27 }
 0x390   : > { %s1155_s21 = smov %s966_s24  ;;  %17 = sbr.rel (!%p15_p9) target bundleno = 3 (0x3), region = 85 }
 0x395   :  { %704 = vsyncpa [#allocation3], 1 }
 0x396   :  { %706 = vsyncpa [#allocation3 + $0x1], 1 }

</bundles_post_ra>
